<compile_context>
chip_gen: v7x
topology: tpu7x:2x2x1
jax: 0.10.0
libtpu: 0.0.40
codegen_flags: <defaults>
</compile_context>

<pallas_src>
import math

import jax
import jax.numpy as jnp
from jax.experimental import pallas as pl
from jax.experimental.pallas import tpu as pltpu

_LANES = 128
_TM_MAX = 8192                    # max packed rows per grid step
_BLOCK_BYTES = 4 * 1024 * 1024    # target f32 output-block bytes per buffer
_SPLIT_ROWS = 4096                # above this, keep >= 4 grid steps (megacore)


def _time2vec_kernel(tau_ref, wexp_ref, b_ref, out_ref):
    # tau_ref : (TM, P)      packed timestamps (P logical rows per physical row)
    # wexp_ref: (P, P*D)     block-diagonal expansion of [w0 | w] (resident)
    # b_ref   : (1, P*D)     [b0 | b] tiled P times along lanes    (resident)
    # out_ref : (TM, P*D)
    p, width = wexp_ref.shape
    d = width // p

    # Lane expansion + multiply fused into one tiny MXU matmul:
    #   lin[r, q*D + j] = tau[r, q] * w_full[j] + b_full[j]
    lin = jnp.dot(tau_ref[...], wexp_ref[...],
                  preferred_element_type=jnp.float32,
                  precision=jax.lax.Precision.HIGHEST) + b_ref[...]

    # Lane k holds the "linear" (non-sine) feature iff k % D == 0.
    lane = jax.lax.broadcasted_iota(jnp.int32, (1, width), 1)
    is_linear = (lane % d) == 0

    # sin runs on the EUP for every lane; linear lanes take `lin` via select.
    out_ref[...] = jnp.where(is_linear, lin, jnp.sin(lin))


def _pick_row_tile(n_rows, width):
    """Row tile: big enough to amortize ~0.35us/step, small enough for VMEM."""
    tm = min(_TM_MAX, max(8, (_BLOCK_BYTES // (4 * width)) // 8 * 8))
    if n_rows >= _SPLIT_ROWS:
        # Keep >= 4 grid steps so the 'parallel' axis can shard across the
        # two TensorCores on v7x (neutral on v5e/v6e).
        tm = min(tm, ((pl.cdiv(n_rows, 4) + 7) // 8) * 8)
    return min(tm, n_rows)


def time2vec_forward(tau, w0, b0, w, b):
    """Time2Vec sine activation. Returns tau.shape + (output_dim,) in float32."""
    orig_shape = tau.shape

    # Fused parameter vectors [w0 | w], [b0 | b].
    w_full = jnp.concatenate([w0.reshape(1), w.reshape(-1)]).astype(jnp.float32)
    b_full = jnp.concatenate([b0.reshape(1), b.reshape(-1)]).astype(jnp.float32)
    d = int(w_full.shape[0])

    # Pack P logical rows per physical row so the store width P*D = lcm(D,128)
    # is always a multiple of 128 lanes (unmasked, lane-dense stores).
    p = _LANES // math.gcd(d, _LANES)
    width = p * d

    # Block-diagonal expansion matrix for the MXU: wexp[q, q*D + j] = w_full[j].
    eye = jnp.eye(p, dtype=jnp.float32)
    wexp = (eye[:, :, None] * w_full[None, None, :]).reshape(p, width)
    b_tiled = jnp.tile(b_full[None, :], (1, p))                       # (1, P*D)

    # Flatten + pad tau to a whole number of packed rows.
    tau_flat = tau.reshape(-1).astype(jnp.float32)
    n = tau_flat.shape[0]
    n_rows = pl.cdiv(n, p)
    n_pad = n_rows * p
    if n_pad != n:
        tau_flat = jnp.pad(tau_flat, (0, n_pad - n))
    tau_packed = tau_flat.reshape(n_rows, p)

    tm = _pick_row_tile(n_rows, width)
    grid = (pl.cdiv(n_rows, tm),)

    out_packed = pl.pallas_call(
        _time2vec_kernel,
        out_shape=jax.ShapeDtypeStruct((n_rows, width), jnp.float32),
        grid=grid,
        in_specs=[
            # tau is the only input that scales with N; its (TM, P) block is
            # lane-padded to 128 in VMEM — accounted for in the tile budget.
            pl.BlockSpec((tm, p), lambda i: (i, 0)),
            pl.BlockSpec((p, width), lambda i: (0, 0)),    # wexp: resident
            pl.BlockSpec((1, width), lambda i: (0, 0)),    # b:    resident
        ],
        out_specs=pl.BlockSpec((tm, width), lambda i: (i, 0)),
        compiler_params=pltpu.CompilerParams(
            dimension_semantics=("parallel",),
            # Explicit limit: double-buffered tau + out blocks (~16 MiB at
            # TM=8192) exceed v5e's 16 MiB default scoped VMEM.
            vmem_limit_bytes=32 * 1024 * 1024),
        cost_estimate=pl.CostEstimate(
            flops=2 * n_rows * p * width + n_rows * width,
            transcendentals=n_rows * width,
            bytes_accessed=4 * (n_pad + n_rows * width + p * width + width)),
    )(tau_packed, wexp, b_tiled)

    # Unpack (n_rows, P*D) -> (n, D).  Row-major element order is identical,
    # but the minor dim changes 128 -> D, so XLA inserts a relayout copy here.
    # If the consumer can read the packed layout directly, skip this reshape.
    out = out_packed.reshape(n_pad, d)
    if n_pad != n:
        out = out[:n]
    return out.reshape(*orig_shape, d)


def _reference(tau, w0, b0, w, b):
    tau = tau[..., None]
    linear_part = tau * w0.reshape(1, 1) + b0.reshape(1)
    periodic_part = jnp.sin(tau * w.reshape(1, -1) + b.reshape(-1))
    return jnp.concatenate([linear_part, periodic_part], axis=-1)


if __name__ == "__main__":
    output_dim = 32
    batch, seq = 2, 8

    key = jax.random.PRNGKey(0)
    k0, k1, k2, k3, k4 = jax.random.split(key, 5)
    w0 = jax.random.normal(k0, (1, 1), dtype=jnp.float32)
    b0 = jax.random.normal(k1, (1,), dtype=jnp.float32)
    w = jax.random.normal(k2, (1, output_dim - 1), dtype=jnp.float32)
    b = jax.random.normal(k3, (output_dim - 1,), dtype=jnp.float32)
    tau = jax.random.normal(k4, (batch, seq), dtype=jnp.float32)

    out = jax.block_until_ready(time2vec_forward(tau, w0, b0, w, b))
    ref = _reference(tau, w0, b0, w, b)

    assert out.shape == (batch, seq, output_dim), out.shape
    assert jnp.allclose(out, ref, atol=1e-5, rtol=1e-5), float(
        jnp.max(jnp.abs(out - ref)))

    print("KERNEL_OK")
</pallas_src>

<mosaic_0001>
module attributes {stable_mosaic.version = 11 : i64} {
  func.func @_time2vec_kernel(%arg0: i32, %arg1: memref<4x4xf32, #tpu.memory_space<vmem>>, %arg2: memref<4x128xf32, #tpu.memory_space<vmem>>, %arg3: memref<1x128xf32, #tpu.memory_space<vmem>>, %arg4: memref<4x128xf32, #tpu.memory_space<vmem>>) attributes {dimension_semantics = [#tpu.dimension_semantics<parallel>], iteration_bounds = array<i64: 1>, scalar_prefetch = 0 : i64, scratch_operands = 0 : i64, tpu.core_type = #tpu.core_type<tc>, window_params = [{transform_indices = @transform_0, window_bounds = array<i64: 4, 4>}, {pipeline_mode = #tpu.pipeline_mode<synchronous>, transform_indices = @transform_1, window_bounds = array<i64: 4, 128>}, {pipeline_mode = #tpu.pipeline_mode<synchronous>, transform_indices = @transform_2, window_bounds = array<i64: 1, 128>}, {transform_indices = @transform_3, window_bounds = array<i64: 4, 128>}]} {
    %c0 = arith.constant 0 : index
    %c0_0 = arith.constant 0 : index
    %0 = vector.load %arg1[%c0, %c0_0] : memref<4x4xf32, #tpu.memory_space<vmem>>, vector<4x4xf32>
    %c0_1 = arith.constant 0 : index
    %c0_2 = arith.constant 0 : index
    %1 = vector.load %arg2[%c0_1, %c0_2] : memref<4x128xf32, #tpu.memory_space<vmem>>, vector<4x128xf32>
    %cst = arith.constant dense<0.000000e+00> : vector<4x128xf32>
    %2 = tpu.matmul %0, %1, %cst {dimension_numbers = #tpu.dot_dimension_numbers<[1], [0], [0], [1], [0, 0, 1, 1], [], []>, precision = #tpu.contract_precision<fp32>} : vector<4x4xf32>, vector<4x128xf32>, vector<4x128xf32> -> vector<4x128xf32>
    %c0_3 = arith.constant 0 : index
    %c0_4 = arith.constant 0 : index
    %3 = vector.load %arg3[%c0_3, %c0_4] : memref<1x128xf32, #tpu.memory_space<vmem>>, vector<1x128xf32>
    %4 = vector.broadcast %3 : vector<1x128xf32> to vector<4x128xf32>
    %5 = arith.addf %2, %4 : vector<4x128xf32>
    %6 = tpu.iota {dimensions = array<i32: 1>} : vector<1x128xi32>
    %c32_i32 = arith.constant 32 : i32
    %c0_i32 = arith.constant 0 : i32
    %7 = arith.cmpi eq, %c32_i32, %c0_i32 : i32
    %c1_i32 = arith.constant 1 : i32
    %8 = arith.select %7, %c1_i32, %c32_i32 : i32
    %9 = vector.broadcast %8 : i32 to vector<1x128xi32>
    %10 = arith.remsi %6, %9 : vector<1x128xi32>
    %c0_i32_5 = arith.constant 0 : i32
    %11 = vector.broadcast %c0_i32_5 : i32 to vector<1x128xi32>
    %12 = arith.cmpi ne, %10, %11 : vector<1x128xi32>
    %c0_i32_6 = arith.constant 0 : i32
    %13 = vector.broadcast %c0_i32_6 : i32 to vector<1x128xi32>
    %14 = arith.cmpi slt, %10, %13 : vector<1x128xi32>
    %c0_i32_7 = arith.constant 0 : i32
    %15 = arith.cmpi slt, %8, %c0_i32_7 : i32
    %16 = vector.broadcast %15 : i1 to vector<1x128xi1>
    %17 = vector.broadcast %16 : vector<1x128xi1> to vector<1x128xi1>
    %18 = arith.xori %14, %17 : vector<1x128xi1>
    %19 = arith.andi %18, %12 : vector<1x128xi1>
    %20 = vector.broadcast %8 : i32 to vector<1x128xi32>
    %21 = arith.addi %10, %20 : vector<1x128xi32>
    %22 = arith.select %19, %21, %10 : vector<1x128xi1>, vector<1x128xi32>
    %c0_i32_8 = arith.constant 0 : i32
    %23 = vector.broadcast %c0_i32_8 : i32 to vector<1x128xi32>
    %24 = arith.cmpi eq, %22, %23 : vector<1x128xi32>
    %25 = math.sin %5 : vector<4x128xf32>
    %26 = vector.shape_cast %24 : vector<1x128xi1> to vector<1x128xi1>
    %27 = vector.broadcast %26 : vector<1x128xi1> to vector<4x128xi1>
    %28 = arith.select %27, %5, %25 : vector<4x128xi1>, vector<4x128xf32>
    %c0_9 = arith.constant 0 : index
    %c0_10 = arith.constant 0 : index
    %29 = vector.load %arg4[%c0_9, %c0_10] : memref<4x128xf32, #tpu.memory_space<vmem>>, vector<4x128xf32>
    tpu.vector_store %arg4[%c0_9, %c0_10], %28 {strides = array<i32>} : memref<4x128xf32, #tpu.memory_space<vmem>>, vector<4x128xf32>,
    return
  }
  func.func @transform_0(%arg0: i32) -> (i32, i32) {
    %c0_i32 = arith.constant 0 : i32
    %c0_i32_0 = arith.constant 0 : i32
    return %arg0, %c0_i32 : i32, i32
  }
  func.func @transform_1(%arg0: i32) -> (i32, i32) {
    %c0_i32 = arith.constant 0 : i32
    %c0_i32_0 = arith.constant 0 : i32
    %c0_i32_1 = arith.constant 0 : i32
    return %c0_i32, %c0_i32_0 : i32, i32
  }
  func.func @transform_2(%arg0: i32) -> (i32, i32) {
    %c0_i32 = arith.constant 0 : i32
    %c0_i32_0 = arith.constant 0 : i32
    %c0_i32_1 = arith.constant 0 : i32
    return %c0_i32, %c0_i32_0 : i32, i32
  }
  func.func @transform_3(%arg0: i32) -> (i32, i32) {
    %c0_i32 = arith.constant 0 : i32
    %c0_i32_0 = arith.constant 0 : i32
    return %arg0, %c0_i32 : i32, i32
  }
}

</mosaic_0001>

<bundles_post_ra>
// kernel: tpu_custom_call.1
= control target key start
LH: loop header
LB: loop body
LE: loop exit
PB: predicated region body
PF: predicated region fallthrough
CT: control target
= control target key end

     0   :  { %8 = vsyncpa [#allocation3], 0  ;;  %s887_s0 = inlined_call_operand.hbm [shape: f32[4,4], index: 0, kind: input, shape index: {}]   ;;  %s888_s1 = inlined_call_operand.hbm [shape: f32[4,128], index: 1, kind: input, shape index: {}]   ;;  %s889_s2 = inlined_call_operand.vmem [shape: f32[1,128], index: 2, kind: input, shape index: {}]   ;;  %s890_s3 = inlined_call_operand.hbm [shape: f32[4,128], index: 3, kind: output, shape index: {}]  }
   0x1   :  { %9 = vsyncpa [#allocation6], 0 }
   0x2   :  { %10 = vsyncpa [#allocation4], 0  ;;  %s789_s12 = smov [#allocation2]   ;;  %s790_s14 = smov [#allocation5]  }
   0x3   :  { %s17_s13 = sshll.u32 %s789_s12, 4  ;;  %s27_s15 = sshll.u32 %s790_s14, 4  ;;  %s18_s13 = int_to_ptr.vmem [resolvable:$true] %s17_s13  ;;  %s28_s15 = int_to_ptr.vmem [resolvable:$true] %s27_s15 }
   0x4   :  { %s717_s18 = scalar_lea.hbm %s887_s0, 64 }
   0x5   :  { %p718_p0 = scmp.ne.s32.totalorder %s887_s0, %s717_s18  ;;  %p721_p1 = scmp.lt.u32.totalorder %s717_s18, %s887_s0 }
   0x7   :  { %p723_p2 = pnand %p721_p1, %p718_p0 }
   0x9   :  { %726 = shalt.err (!%p723_p2)
}
   0xa   :  { %s727_s23 = scalar_lea.vmem %s18_s13, 64  ;;  %p732_p4 = scmp.lt.s32.totalorder %s18_s13, %s18_s13 }
   0xb   :  { %p728_p3 = scmp.ne.s32.totalorder %s18_s13, %s727_s23  ;;  %p733_p5 = scmp.lt.s32.totalorder %s727_s23, %s727_s23 }
   0xd   :  { %p734_p6 = por %p733_p5, %p732_p4 }
   0xf   :  { %p735_p7 = pnand %p734_p6, %p728_p3 }
  0x11   :  { %738 = shalt.err (!%p735_p7)
}
  0x12   :  { %20 = dma.hbm_to_vmem [thread:$0]  %s887_s0, 64, %s18_s13, [#allocation3]  }
  0x13   :  { %s739_s28 = scalar_lea.hbm %s888_s1, 64 }
  0x14   :  { %p740_p8 = scmp.ne.s32.totalorder %s888_s1, %s739_s28  ;;  %p743_p9 = scmp.lt.u32.totalorder %s739_s28, %s888_s1 }
  0x16   :  { %p745_p10 = pnand %p743_p9, %p740_p8 }
  0x18   :  { %748 = shalt.err (!%p745_p10)
}
  0x19   :  { %s749_s6 = scalar_lea.vmem %s28_s15, 64  ;;  %p754_p12 = scmp.lt.s32.totalorder %s28_s15, %s28_s15 }
  0x1a   :  { %p750_p11 = scmp.ne.s32.totalorder %s28_s15, %s749_s6  ;;  %p755_p13 = scmp.lt.s32.totalorder %s749_s6, %s749_s6 }
  0x1c   :  { %p756_p0 = por %p755_p13, %p754_p12 }
  0x1e   :  { %p757_p1 = pnand %p756_p0, %p750_p11 }
  0x20   :  { %760 = shalt.err (!%p757_p1)
}
  0x21   :  { %30 = dma.hbm_to_vmem [thread:$0]  %s888_s1, 64, %s28_s15, [#allocation6]  }
  0x22   :  { %783 = dma.done.wait [#allocation3], 64  }
  0x23   :  { %784 = vsyncadd [#allocation3], 4294967232 }
  0x24   :  { %785 = dma.done.wait [#allocation6], 64  }
  0x25   :  { %786 = vsyncadd [#allocation6], 4294967232  ;;  %v791_v0 = vmov 0.0   ;;  %vm792_vm0 = vmmov 0   ;;  %vm52_vm1 = vcmask 1043456   ;;  %vm48_vm2 = vcmask 31744  }
  0x26   :  { %673 = vmatprep.subr.mxu0 %v791_v0  ;;  %675 = vmatprep.mubr.msk.f32.mxu0 %vm792_vm0, %v791_v0  ;;  %v40_v1 = vld [vmem:[#allocation5] sm:$0xf]  ;;  %v39_v2 = vld [vmem:[#allocation2] sm:$0xf]  ;;  %v793_v32 = vmov 683565275  }
  0x27   :  { %658 = vmatprep.subr.mxu1 %v791_v0  ;;  %660 = vmatprep.mubr.msk.f32.mxu1 %vm792_vm0, %v791_v0  ;;  %v54_v3 = vsel %vm52_vm1, %v40_v1, 0  ;;  %v50_v4 = vsel %vm48_vm2, %v39_v2, 0  ;;  %v641_v17 = vld [vmem:[%s889_s2] ss:$0 sm:$0xff]  ;;  %v794_v34 = vmov 2475754826  }
  0x28   :  { %v57_v5 = vand.u32 4294901760, %v54_v3  ;;  %v122_v6 = vand.u32 4294901760, %v50_v4  ;;  %v795_v37 = vmov 2131351028   ;;  %v796_v40 = vmov 2102212464  }
  0x29   :  { %v797_v43 = vmov 920167782   ;;  %v798_v46 = vmov 1326507024   ;;  %s799_s2 = smov [#allocation7]  }
  0x2a   :  { %v134_v7 = vsub.f32 %v54_v3, %v57_v5  ;;  %674 = vmatpush3.msra.mxu0 %v57_v5  ;;  %v123_v8 = vsub.f32 %v50_v4, %v122_v6  ;;  %659 = vmatpush3.msra.mxu1 %v57_v5  ;;  %s631_s9 = sshll.u32 %s799_s2, 4  ;;  %s632_s9 = int_to_ptr.vmem [resolvable:$true] %s631_s9 }
  0x2b   :  { %663 = vmatprep.subr.mxu1 %v791_v0  ;;  %678 = vmatprep.subr.mxu0 %v791_v0  ;;  %s761_s10 = scalar_lea.vmem %s632_s9, 64  ;;  %p766_p3 = scmp.lt.s32.totalorder %s632_s9, %s632_s9 }
  0x2c   :  { %v124_v9 = vand.u32 4294901760, %v123_v8  ;;  %v135_v10 = vand.u32 4294901760, %v134_v7  ;;  %p762_p2 = scmp.ne.s32.totalorder %s632_s9, %s761_s10  ;;  %p767_p4 = scmp.lt.s32.totalorder %s761_s10, %s761_s10 }
  0x2e   :  { %676 = vmatmul.mubr.f32.vlgmr.msra.gmra.mrb[0].mxu0 %v124_v9  ;;  %v125_v11 = vsub.f32 %v123_v8, %v124_v9  ;;  %v136_v12 = vsub.f32 %v134_v7, %v135_v10  ;;  %p768_p5 = por %p767_p4, %p766_p3 }
  0x2f   :  { %679 = vmatpush3.msra.mxu0 %v135_v10  ;;  %680 = vmatprep.mubr.msk.f32.mxu0 %vm792_vm0, %v791_v0 }
  0x30   :  { %v126_v13 = vand.u32 4294901760, %v125_v11  ;;  %v137_v14 = vand.u32 4294901760, %v136_v12  ;;  %683 = vmatprep.subr.mxu0 %v791_v0  ;;  %p769_p6 = pnand %p768_p5, %p762_p2 }
  0x32   :  { %661 = vmatmul.mubr.f32.vlgmr.msra.gmra.mrb[0].mxu1 %v126_v13 }
  0x33   :  { %664 = vmatpush3.msra.mxu1 %v137_v14  ;;  %665 = vmatprep.mubr.msk.f32.mxu1 %vm792_vm0, %v791_v0 }
  0x34   :  { %668 = vmatprep.subr.mxu1 %v791_v0 }
  0x36   :  { %681 = vmatmul.mubr.f32.vlgmr.msra.gmra.mrb[0].mxu0 %v122_v6 }
  0x37   :  { %684 = vmatpush3.msra.mxu0 %v57_v5  ;;  %685 = vmatprep.mubr.msk.f32.mxu0 %vm792_vm0, %v791_v0 }
  0x3a   :  { %666 = vmatmul.mubr.f32.vlgmr.msra.gmra.mrb[0].mxu1 %v122_v6 }
  0x3b   :  { %669 = vmatpush3.msra.mxu1 %v134_v7  ;;  %670 = vmatprep.mubr.msk.f32.mxu1 %vm792_vm0, %v791_v0 }
  0x3e   :  { %686 = vmatmul.mubr.f32.vlgmr.msra.gmra.mrb[0].mxu0 %v122_v6 }
  0x42   :  { %671 = vmatmul.mubr.f32.vlgmr.msra.gmra.mrb[0].mxu1 %v123_v8 }
 0x111   :  { %v498_v15 = vpop.f32.mrb[0].mxu0 }
 0x112   :  { %v687_v16 = vpop.f32.mrb[1].mxu0 }
 0x115   :  { %v278_v18 = vpop.f32.mrb[0].mxu1 }
 0x116   :  { %v688_v19 = vadd.f32 %v641_v17, %v278_v18  ;;  %v672_v20 = vpop.f32.mrb[1].mxu1 }
 0x118   :  { %v853_v21 = vadd.f32 %v688_v19, %v498_v15 }
 0x11a   :  { %v520_v22 = vand.u32 2139095040, %v853_v21  ;;  %v517_v26 = vand.u32 2147483647, %v853_v21  ;;  %vm519_vm10 = vcmp.lt.s32.totalorder %v853_v21, 0  ;;  %vm609_vm0 = vweird.f32 %v853_v21 }
 0x11c   :  { %v521_v23 = vshrl.u32 %v520_v22, 23  ;;  %v524_v30 = vand.u32 8388607, %v517_v26  ;;  %vm518_vm11 = vcmp.le.f32.partialorder %v517_v26, 0.7853982 }
 0x11e   :  { %v642_v24 = vadd.s32 4294967169, %v521_v23  ;;  %v525_v48 = vor.u32 8388608, %v524_v30 }
 0x120   :  { %v527_v25 = vadd.s32 1, %v642_v24  ;;  %v565_v62 = vshll.u32 %v525_v48, 8 }
 0x122   :  { %vm528_vm3 = vcmp.gt.s32.totalorder %v527_v25, 0 }
 0x123   :  { %v529_v27 = vsel %vm528_vm3, %v527_v25, 0 }
 0x124   :  { %v531_v28 = vand.u32 31, %v529_v27  ;;  %v530_v31 = vshrl.u32 %v529_v27, 5 }
 0x126   :  { %v532_v29 = vsub.s32 32, %v531_v28  ;;  %v534_v33 = vshll.u32 %v793_v32, %v531_v28  ;;  %v537_v35 = vshll.u32 %v794_v34, %v531_v28  ;;  %v540_v39 = vshll.u32 %v795_v37, %v531_v28 }
 0x127   :  { %v543_v42 = vshll.u32 %v796_v40, %v531_v28  ;;  %v546_v45 = vshll.u32 %v797_v43, %v531_v28  ;;  %vm549_vm4 = vcmp.lt.s32.totalorder %v530_v31, 1  ;;  %vm552_vm5 = vcmp.lt.s32.totalorder %v530_v31, 4 }
 0x128   :  { %v535_v36 = vshrl.u32 %v794_v34, %v532_v29  ;;  %v538_v38 = vshrl.u32 %v795_v37, %v532_v29  ;;  %v541_v41 = vshrl.u32 %v796_v40, %v532_v29  ;;  %v544_v44 = vshrl.u32 %v797_v43, %v532_v29 }
 0x129   :  { %v547_v47 = vshrl.u32 %v798_v46, %v532_v29  ;;  %v533_v57 = vshrl.u32 %v793_v32, %v532_v29  ;;  %vm551_vm6 = vcmp.lt.s32.totalorder %v530_v31, 3  ;;  %vm550_vm7 = vcmp.lt.s32.totalorder %v530_v31, 2 }
 0x12a   :  { %v536_v49 = vor.u32 %v535_v36, %v534_v33  ;;  %v539_v50 = vor.u32 %v538_v38, %v537_v35  ;;  %v542_v51 = vor.u32 %v541_v41, %v540_v39  ;;  %v545_v52 = vor.u32 %v544_v44, %v543_v42 }
 0x12b   :  { %v548_v53 = vor.u32 %v547_v47, %v546_v45  ;;  %v502_v41 = vlaneseq }
 0x12c   :  { %v554_v54 = vsel %vm552_vm5, %v542_v51, 2102212464  ;;  %v557_v55 = vsel %vm549_vm4, %v536_v49, %v539_v50  ;;  %v561_v56 = vsel %vm549_vm4, %v539_v50, %v542_v51  ;;  %v558_v58 = vsel %vm552_vm5, %v545_v52, 920167782 }
 0x12d   :  { %v562_v59 = vsel %vm552_vm5, %v548_v53, 1326507024  ;;  %v559_v60 = vsel %vm551_vm6, %v542_v51, %v558_v58  ;;  %v553_v63 = vsel %vm549_vm4, %v533_v57, %v536_v49  ;;  %v555_v0 = vsel %vm551_vm6, %v539_v50, %v554_v54 }
 0x12e   :  { %v563_v61 = vsel %vm551_vm6, %v545_v52, %v562_v59  ;;  %v560_v1 = vsel %vm550_vm7, %v557_v55, %v559_v60  ;;  %v556_v7 = vsel %vm550_vm7, %v553_v63, %v555_v0  ;;  %v503_v43 = vand.u32 127, %v502_v41 }
 0x12f   :  { %v564_v2 = vsel %vm550_vm7, %v561_v56, %v563_v61  ;;  %v862_v5 = vmul.u32.u64.low %v565_v62, %v560_v1  ;;  %v863_v6 = vmul.u32.u64.high %v565_v62, %v560_v1, %v862_v5  ;;  %v572_v9 = vmul.u32 %v565_v62, %v556_v7 }
 0x130   :  { %v859_v3 = vmul.u32.u64.low %v565_v62, %v564_v2  ;;  %v860_v4 = vmul.u32.u64.high %v565_v62, %v564_v2, %v859_v3  ;;  %v508_v46 = vand.u32 31, %v503_v43 }
 0x131   :  { %v575_v8 = vadd.s32 1, %v863_v6 }
 0x132   :  { %vm574_vm8 = vc.u32 %v860_v4, %v862_v5  ;;  %v573_v22 = vadd.s32 %v862_v5, %v860_v4  ;;  %vm516_vm14 = vcmp.eq.s32.totalorder %v508_v46, 0 }
 0x133   :  { %v576_v10 = vsel %vm574_vm8, %v575_v8, %v863_v6 }
 0x134   :  { %v577_v11 = vadd.s32 %v576_v10, %v572_v9 }
 0x136   :  { %v578_v12 = vadd.s32 536870912, %v577_v11 }
 0x138   :  { %v579_v13 = vshrl.u32 %v578_v12, 30 }
 0x13a   :  { %v580_v14 = vshll.u32 %v579_v13, 30  ;;  %v603_v35 = vsub.s32 4, %v579_v13 }
 0x13c   :  { %v581_v15 = vsub.s32 %v577_v11, %v580_v14  ;;  %v604_v38 = vsel %vm519_vm10, %v603_v35, %v579_v13 }
 0x13d   :  { %v606_v40 = vsel %vm518_vm11, 0, %v604_v38 }
 0x13e   :  { %v583_v16 = vsub.s32 0, %v581_v15  ;;  %v610_v42 = vadd.s32 3, %v606_v40 }
 0x140   :  { %v643_v17 = vmin.u32 %v583_v16, %v581_v15  ;;  %v611_v44 = vand.u32 3, %v610_v42 }
 0x142   :  { %v585_v18 = vclz %v643_v17  ;;  %vm616_vm12 = vcmp.eq.s32.totalorder %v611_v44, 2  ;;  %vm613_vm13 = vcmp.eq.s32.totalorder %v611_v44, 0  ;;  %vm612_vm15 = vcmp.lt.s32.totalorder %v611_v44, 2 }
 0x144   :  { %v644_v19 = vadd.s32 4294967294, %v585_v18 }
 0x146   :  { %vm645_vm9 = vcmp.lt.s32.totalorder %v644_v19, 0 }
 0x147   :  { %v588_v20 = vsel %vm645_vm9, 0, %v644_v19 }
 0x148   :  { %v589_v23 = vsub.s32 32, %v588_v20  ;;  %v593_v24 = vsub.s32 4294967266, %v588_v20  ;;  %v590_v25 = vshll.u32 %v581_v15, %v588_v20 }
 0x14a   :  { %v591_v27 = vshrl.u32 %v573_v22, %v589_v23  ;;  %v594_v28 = vadd.s32 127, %v593_v24 }
 0x14c   :  { %v592_v29 = vor.u32 %v591_v27, %v590_v25  ;;  %v595_v30 = vshll.u32 %v594_v28, 23 }
 0x14e   :  { %v596_v31 = vor.u32 4788187, %v595_v30  ;;  %v599_v33 = vcvt.s32.f32 %v592_v29 }
 0x150   :  { %v597_v32 = vand.u32 2147483647, %v596_v31 }
 0x152   :  { %v600_v34 = vmul.f32 %v599_v33, %v597_v32 }
 0x154   :  { %v601_v36 = vxor.u32 2147483648, %v600_v34 }
 0x156   :  { %v602_v37 = vsel %vm519_vm10, %v601_v36, %v600_v34 }
 0x157   :  { %v605_v39 = vsel %vm518_vm11, %v853_v21, %v602_v37 }
 0x158   :  { %713 = vcosq.f32 %v605_v39 }
 0x159   :  { %715 = vsinq.f32 %v605_v39 }
 0x162   :  { %v714_v45 = vpop.eup %713 }
 0x163   :  { %v716_v47 = vpop.eup %715  ;;  %v617_v48 = vxor.u32 2147483648, %v714_v45 }
 0x164   :  { %v614_v49 = vxor.u32 2147483648, %v716_v47 }
 0x165   :  { %v618_v50 = vsel %vm616_vm12, %v617_v48, %v716_v47 }
 0x166   :  { %v615_v26 = vsel %vm613_vm13, %v714_v45, %v614_v49 }
 0x167   :  { %v619_v51 = vsel %vm612_vm15, %v615_v26, %v618_v50 }
 0x168   :  { %v620_v52 = vsel %vm609_vm0, nan, %v619_v51 }
 0x169   :  { %v623_v53 = vsel %vm516_vm14, %v853_v21, %v620_v52 }
 0x16a   :  { %624 = vst [vmem:[#allocation7] sm:$0xf] %v623_v53 }
 0x16b   :  { %772 = shalt.err (!%p769_p6)
}
 0x16c   :  { %s773_s13 = scalar_lea.hbm %s890_s3, 64 }
 0x16d   :  { %p774_p7 = scmp.ne.s32.totalorder %s890_s3, %s773_s13  ;;  %p777_p8 = scmp.lt.u32.totalorder %s773_s13, %s890_s3 }
 0x16f   :  { %p779_p9 = pnand %p777_p8, %p774_p7 }
 0x171   :  { %782 = shalt.err (!%p779_p9)
}
 0x172   :  { %634 = dma.vmem_to_hbm [thread:$0]  %s632_s9, 64, %s890_s3, [#allocation4]  }
 0x173   :  { %787 = dma.done.wait [#allocation4], 64  }
 0x174   :  { %788 = vsyncadd [#allocation4], 4294967232 }
 0x175   :  { %638 = vsyncpa [#allocation3], 1 }
 0x176   :  { %639 = vsyncpa [#allocation6], 1 }
 0x177   :  { %640 = vsyncpa [#allocation4], 1 }

</bundles_post_ra>
